<compile_context>
chip_gen: v7x
topology: tpu7x:2x2x1
jax: 0.10.0
libtpu: 0.0.40
codegen_flags: <defaults>
</compile_context>

<pallas_src>
import jax
import jax.numpy as jnp
from jax.experimental import pallas as pl
from jax.experimental.pallas import tpu as pltpu

_LANE = 128        # lane width (last dim)
_SUBLANE = 8       # f32 sublane count (second-to-last dim)
_SMALL_BYTES = 6 * 1024 * 1024   # whole problem resident in VMEM -> grid-less path


def _round_up(x, m):
    return (x + m - 1) // m * m


def _small_linear_kernel(x_ref, w_ref, o_ref):
    # x: (B, In), w: (In, Out) -- full (unpadded) arrays in VMEM, single MXU pass.
    o_ref[...] = jnp.dot(
        x_ref[...], w_ref[...], preferred_element_type=jnp.float32
    ).astype(o_ref.dtype)


def _tiled_linear_kernel(x_ref, w_ref, o_ref, acc_ref):
    # Grid = (M tiles, N tiles, K tiles); K is the innermost reduction axis.
    @pl.when(pl.program_id(2) == 0)
    def _():
        acc_ref[...] = jnp.zeros_like(acc_ref)

    acc_ref[...] += jnp.dot(
        x_ref[...], w_ref[...], preferred_element_type=jnp.float32
    )

    @pl.when(pl.program_id(2) == pl.num_programs(2) - 1)
    def _():
        o_ref[...] = acc_ref[...].astype(o_ref.dtype)


def slp_forward(x, weight, *, tm=512, tn=256, tk=512):
    """y = x @ weight.T (no bias). weight is PyTorch-layout (output_size, input_size)."""
    B, In = x.shape
    Out, In2 = weight.shape
    assert In == In2, "weight / input size mismatch"

    # One-time layout change: (Out, In) -> (In, Out) so the kernel's contraction is
    # MXU-native (no in-kernel weight transpose).  In a real model this is done once
    # at parameter setup / const-folded under jit.
    w_t = weight.T

    dsize = jnp.dtype(x.dtype).itemsize
    total_bytes = (B * In + In * Out + B * Out) * dsize

    if total_bytes <= _SMALL_BYTES:
        # Small-shape path: no grid, no padding, no output slice.  Whole operands in
        # VMEM; block == full array dims, so no (8,128) divisibility requirement.
        cost = pl.CostEstimate(
            flops=2 * B * In * Out,
            transcendentals=0,
            bytes_accessed=total_bytes,
        )
        return pl.pallas_call(
            _small_linear_kernel,
            out_shape=jax.ShapeDtypeStruct((B, Out), x.dtype),
            in_specs=[
                pl.BlockSpec(memory_space=pltpu.MemorySpace.VMEM),
                pl.BlockSpec(memory_space=pltpu.MemorySpace.VMEM),
            ],
            out_specs=pl.BlockSpec(memory_space=pltpu.MemorySpace.VMEM),
            cost_estimate=cost,
        )(x, w_t)

    # ---------------- tiled M / N / K path ----------------
    # Clamp tiles to the (aligned) problem dims, keeping (8, 128) alignment.
    tm = min(tm, _round_up(B, _SUBLANE))
    tn = min(tn, _round_up(Out, _LANE))
    tk = min(tk, _round_up(In, _LANE))

    B_pad = _round_up(B, tm)
    Out_pad = _round_up(Out, tn)
    In_pad = _round_up(In, tk)

    # Zero-padding K is correctness-neutral; padded M rows / N cols are sliced off.
    if (B_pad, In_pad) != (B, In):
        x = jnp.pad(x, ((0, B_pad - B), (0, In_pad - In)))
    if (In_pad, Out_pad) != (In, Out):
        w_t = jnp.pad(w_t, ((0, In_pad - In), (0, Out_pad - Out)))

    grid = (B_pad // tm, Out_pad // tn, In_pad // tk)

    cost = pl.CostEstimate(
        flops=2 * B_pad * In_pad * Out_pad,
        transcendentals=0,
        bytes_accessed=(B_pad * In_pad + In_pad * Out_pad + B_pad * Out_pad) * dsize,
    )

    # Explicit scoped-VMEM budget from the actual block footprint:
    # double-buffered x/w/out blocks + the f32 accumulator scratch, with headroom.
    blk_bytes = (tm * tk + tk * tn + tm * tn) * dsize
    vmem_needed = 2 * blk_bytes + tm * tn * 4
    vmem_limit = int(min(max(2 * vmem_needed, 16 * 1024 * 1024), 48 * 1024 * 1024))

    y = pl.pallas_call(
        _tiled_linear_kernel,
        out_shape=jax.ShapeDtypeStruct((B_pad, Out_pad), x.dtype),
        grid=grid,
        in_specs=[
            pl.BlockSpec((tm, tk), lambda i, j, k: (i, k)),
            pl.BlockSpec((tk, tn), lambda i, j, k: (k, j)),
        ],
        out_specs=pl.BlockSpec((tm, tn), lambda i, j, k: (i, j)),
        scratch_shapes=[pltpu.VMEM((tm, tn), jnp.float32)],
        compiler_params=pltpu.CompilerParams(
            dimension_semantics=("parallel", "parallel", "arbitrary"),
            vmem_limit_bytes=vmem_limit,
        ),
        cost_estimate=cost,
    )(x, w_t)

    return y[:B, :Out]


if __name__ == "__main__":
    key = jax.random.PRNGKey(0)
    kx, kw, kx2, kw2 = jax.random.split(key, 4)

    # knock71-style shapes, kept small: 300 input features -> 4 classes.
    batch, input_size, output_size = 4, 300, 4
    x = jax.random.normal(kx, (batch, input_size), dtype=jnp.float32)
    # nn.init.normal_(self.fc.weight, 0.0, 1.0) -> standard normal weights.
    weight = jax.random.normal(kw, (output_size, input_size), dtype=jnp.float32)

    y = jax.block_until_ready(slp_forward(x, weight))
    y_ref = jnp.dot(x, weight.T, precision=jax.lax.Precision.HIGHEST)
    assert y.shape == (batch, output_size)
    assert jnp.allclose(y, y_ref, atol=1e-4, rtol=1e-4), "mismatch vs reference (small)"

    # Larger shapes exercise the M/N/K-tiled path with a non-multiple batch size
    # (padded M), a non-multiple Out (padded N) and K tiling with the accumulator.
    B2, In2, Out2 = 1000, 1024, 640
    x2 = jax.random.normal(kx2, (B2, In2), dtype=jnp.float32)
    w2 = jax.random.normal(kw2, (Out2, In2), dtype=jnp.float32)
    y2 = jax.block_until_ready(slp_forward(x2, w2))
    y2_ref = jnp.dot(x2, w2.T, precision=jax.lax.Precision.HIGHEST)
    assert y2.shape == (B2, Out2)
    assert jnp.allclose(y2, y2_ref, atol=1e-2, rtol=1e-2), "mismatch vs reference (large)"

    print("KERNEL_OK")
</pallas_src>

<mosaic_0001>
module attributes {stable_mosaic.version = 11 : i64} {
  func.func @_small_linear_kernel(%arg0: memref<4x300xf32, #tpu.memory_space<vmem>>, %arg1: memref<300x4xf32, #tpu.memory_space<vmem>>, %arg2: memref<4x4xf32, #tpu.memory_space<vmem>>) attributes {dimension_semantics = [], scalar_prefetch = 0 : i64, scratch_operands = 0 : i64, tpu.core_type = #tpu.core_type<tc>} {
    %c0 = arith.constant 0 : index
    %c0_0 = arith.constant 0 : index
    %0 = vector.load %arg0[%c0, %c0_0] : memref<4x300xf32, #tpu.memory_space<vmem>>, vector<4x300xf32>
    %c0_1 = arith.constant 0 : index
    %c0_2 = arith.constant 0 : index
    %1 = vector.load %arg1[%c0_1, %c0_2] : memref<300x4xf32, #tpu.memory_space<vmem>>, vector<300x4xf32>
    %cst = arith.constant dense<0.000000e+00> : vector<4x4xf32>
    %2 = tpu.matmul %0, %1, %cst {dimension_numbers = #tpu.dot_dimension_numbers<[1], [0], [0], [1], [0, 0, 1, 1], [], []>} : vector<4x300xf32>, vector<300x4xf32>, vector<4x4xf32> -> vector<4x4xf32>
    %c0_3 = arith.constant 0 : index
    %c0_4 = arith.constant 0 : index
    %3 = vector.load %arg2[%c0_3, %c0_4] : memref<4x4xf32, #tpu.memory_space<vmem>>, vector<4x4xf32>
    tpu.vector_store %arg2[%c0_3, %c0_4], %2 {strides = array<i32>} : memref<4x4xf32, #tpu.memory_space<vmem>>, vector<4x4xf32>,
    return
  }
}

</mosaic_0001>

<bundles_post_ra>
// kernel: tpu_custom_call.1
= control target key start
LH: loop header
LB: loop body
LE: loop exit
PB: predicated region body
PF: predicated region fallthrough
CT: control target
= control target key end

     0   :  { %v350_v7 = vmov 0.0|0.0   ;;  %vm351_vm0 = vmmov 0   ;;  %v352_v13 = vmov 0.0   ;;  %vm59_vm1 = vcmask 1043456   ;;  %s502_s0 = inlined_call_operand.vmem [shape: f32[4,300], index: 0, kind: input, shape index: {}]   ;;  %s503_s1 = inlined_call_operand.vmem [shape: f32[300,4], index: 1, kind: input, shape index: {}]   ;;  %s504_s2 = inlined_call_operand.hbm [shape: f32[4,4], index: 2, kind: output, shape index: {}]  }
   0x1   :  { %v30_v0 = vld [vmem:[%s503_s1 + $0x80] sm:$0xff]  ;;  %v31_v1 = vld [vmem:[%s503_s1 + $0x88] sm:$0xff]  ;;  %v32_v5 = vld [vmem:[%s503_s1 + $0x90] sm:$0xff]  ;;  %310 = vmatprep.subr.bf16.mxu1 %v350_v7  ;;  %275 = vmatprep.mubr.msk.f32.mxu1 %vm351_vm0, %v352_v13 }
   0x2   :  { %v14_v2 = vld [vmem:[%s503_s1] sm:$0xff]  ;;  %v278_v3 = vpack.c.bf16 %v31_v1, %v30_v0  ;;  %v15_v4 = vld [vmem:[%s503_s1 + $0x8] sm:$0xff]  ;;  %v33_v6 = vld [vmem:[%s503_s1 + $0x98] sm:$0xff] }
   0x3   :  { %v280_v8 = vpack.c.bf16 %v15_v4, %v14_v2  ;;  %v282_v9 = vpack.c.bf16 %v33_v6, %v32_v5  ;;  %v16_v10 = vld [vmem:[%s503_s1 + $0x10] sm:$0xff]  ;;  %v17_v11 = vld [vmem:[%s503_s1 + $0x18] sm:$0xff]  ;;  %v34_v12 = vld [vmem:[%s503_s1 + $0xa0] sm:$0xff] }
   0x4   :  { %279 = vmatprep.subr.bf16.mxu0 %v278_v3  ;;  %v35_v14 = vld [vmem:[%s503_s1 + $0xa8] sm:$0xff]  ;;  %v284_v15 = vpack.c.bf16 %v17_v11, %v16_v10  ;;  %v18_v17 = vld [vmem:[%s503_s1 + $0x20] sm:$0xff]  ;;  %v36_v19 = vld [vmem:[%s503_s1 + $0xb0] sm:$0xff] }
   0x5   :  { %281 = vmatpush3.bf16.msra.mxu0 %v280_v8  ;;  %v286_v16 = vpack.c.bf16 %v35_v14, %v34_v12  ;;  %v19_v18 = vld [vmem:[%s503_s1 + $0x28] sm:$0xff]  ;;  %v37_v20 = vld [vmem:[%s503_s1 + $0xb8] sm:$0xff]  ;;  %v46_v22 = vld [vmem:[%s503_s1 + $0x100] sm:$0xff] }
   0x6   :  { %283 = vmatprep.subr.bf16.mxu0 %v282_v9  ;;  %v288_v21 = vpack.c.bf16 %v19_v18, %v18_v17  ;;  %v47_v23 = vld [vmem:[%s503_s1 + $0x108] sm:$0xff]  ;;  %v290_v24 = vpack.c.bf16 %v37_v20, %v36_v19  ;;  %v20_v25 = vld [vmem:[%s503_s1 + $0x30] sm:$0xff]  ;;  %v21_v26 = vld [vmem:[%s503_s1 + $0x38] sm:$0xff] }
   0x7   :  { %v38_v27 = vld [vmem:[%s503_s1 + $0xc0] sm:$0xff]  ;;  %v311_v28 = vpack.c.bf16 %v47_v23, %v46_v22  ;;  %v39_v29 = vld [vmem:[%s503_s1 + $0xc8] sm:$0xff]  ;;  %v48_v30 = vld [vmem:[%s503_s1 + $0x110] sm:$0xff]  ;;  %v292_v33 = vpack.c.bf16 %v21_v26, %v20_v25 }
   0x8   :  { %v49_v31 = vld [vmem:[%s503_s1 + $0x118] sm:$0xff]  ;;  %v12_v34 = vld [vmem:[%s502_s0] sm:$0xff]  ;;  %v51_v36 = vld [vmem:[%s503_s1 + $0x128] sm:$0xf]  ;;  %v294_v37 = vpack.c.bf16 %v39_v29, %v38_v27 }
   0x9   :  { %285 = vmatpush3.bf16.msra.mxu0 %v284_v15  ;;  %312 = vmatpush3.bf16.msra.mxu1 %v311_v28  ;;  %v314_v32 = vpack.c.bf16 %v49_v31, %v48_v30  ;;  %v50_v35 = vld [vmem:[%s503_s1 + $0x120] sm:$0xff]  ;;  %v23_v39 = vld [vmem:[%s503_s1 + $0x48] sm:$0xff]  ;;  %v54_v40 = vcombine.high %v12_v34, %v12_v34  ;;  %v40_v41 = vld [vmem:[%s503_s1 + $0xd0] sm:$0xff] }
   0xa   :  { %287 = vmatprep.subr.bf16.mxu0 %v286_v16  ;;  %313 = vmatprep.subr.bf16.mxu1 %v350_v7  ;;  %v22_v38 = vld [vmem:[%s503_s1 + $0x40] sm:$0xff]  ;;  %v41_v42 = vld [vmem:[%s503_s1 + $0xd8] sm:$0xff] }
   0xd   :  { %289 = vmatpush3.bf16.msra.mxu0 %v288_v21 }
   0xe   :  { %291 = vmatprep.subr.bf16.mxu0 %v290_v24 }
   0xf   :  { %7 = vsyncpa [#allocation3], 0  ;;  %315 = vmatpush3.bf16.msra.mxu1 %v314_v32  ;;  %127 = vmatprep.mubr.f32.mxu0 %v54_v40  ;;  %v317_v43 = vpack.c.bf16 %v51_v36, %v50_v35  ;;  %v296_v44 = vpack.c.bf16 %v23_v39, %v22_v38  ;;  %vm353_vm2 = vmmov 1   ;;  %v298_v45 = vpack.c.bf16 %v41_v42, %v40_v41  ;;  %v24_v46 = vld [vmem:[%s503_s1 + $0x50] sm:$0xff]  ;;  %v25_v47 = vld [vmem:[%s503_s1 + $0x58] sm:$0xff]  ;;  %s354_s4 = smov [#allocation2]  }
  0x10   :  { %316 = vmatprep.subr.bf16.mxu1 %v350_v7  ;;  %vm318_vm3 = vmpackc.low %vm59_vm1, %vm353_vm2  ;;  %v42_v48 = vld [vmem:[%s503_s1 + $0xe0] sm:$0xff]  ;;  %v43_v49 = vld [vmem:[%s503_s1 + $0xe8] sm:$0xff]  ;;  %vm56_vm4 = vcmask 359424   ;;  %v300_v51 = vpack.c.bf16 %v25_v47, %v24_v46  ;;  %s211_s5 = sshll.u32 %s354_s4, 4  ;;  %vm203_vm5 = vcmask 27648   ;;  %s212_s5 = int_to_ptr.vmem [resolvable:$true] %s211_s5 }
  0x11   :  { %293 = vmatpush3.bf16.msra.mxu0 %v292_v33  ;;  %v13_v50 = vld [vmem:[%s502_s0 + $0x8] sm:$0xf]  ;;  %v302_v52 = vpack.c.bf16 %v43_v49, %v42_v48  ;;  %v26_v53 = vld [vmem:[%s503_s1 + $0x60] sm:$0xff]  ;;  %v44_v55 = vld [vmem:[%s503_s1 + $0xf0] sm:$0xff]  ;;  %s326_s6 = scalar_lea.vmem %s212_s5, 64  ;;  %p331_p1 = scmp.lt.s32.totalorder %s212_s5, %s212_s5 }
  0x12   :  { %295 = vmatprep.subr.bf16.mxu0 %v294_v37  ;;  %v27_v54 = vld [vmem:[%s503_s1 + $0x68] sm:$0xff]  ;;  %v45_v56 = vld [vmem:[%s503_s1 + $0xf8] sm:$0xff]  ;;  %v28_v59 = vld [vmem:[%s503_s1 + $0x70] sm:$0xff]  ;;  %p327_p0 = scmp.ne.s32.totalorder %s212_s5, %s326_s6  ;;  %p332_p2 = scmp.lt.s32.totalorder %s326_s6, %s326_s6 }
  0x13   :  { %319 = vmatpush3.bf16.msk.msra.mxu1 %vm318_vm3, %v317_v43  ;;  %v304_v57 = vpack.c.bf16 %v27_v54, %v26_v53  ;;  %v306_v58 = vpack.c.bf16 %v45_v56, %v44_v55  ;;  %v29_v60 = vld [vmem:[%s503_s1 + $0x78] sm:$0xff] }
  0x14   :  { %v308_v61 = vpack.c.bf16 %v29_v60, %v28_v59  ;;  %p333_p3 = por %p332_p2, %p331_p1 }
  0x15   :  { %297 = vmatpush3.bf16.msra.mxu0 %v296_v44 }
  0x16   :  { %299 = vmatprep.subr.bf16.mxu0 %v298_v45  ;;  %276 = vmatmul.mubr.msk.f32.vlgmr.msra.gmra.mrb[0].mxu1 %vm56_vm4, %v13_v50  ;;  %p334_p4 = pnand %p333_p3, %p327_p0 }
  0x19   :  { %301 = vmatpush3.bf16.msra.mxu0 %v300_v51 }
  0x1a   :  { %303 = vmatprep.subr.bf16.mxu0 %v302_v52 }
  0x1d   :  { %305 = vmatpush3.bf16.msra.mxu0 %v304_v57 }
  0x1e   :  { %307 = vmatprep.subr.bf16.mxu0 %v306_v58 }
  0x21   :  { %309 = vmatpush3.bf16.msra.mxu0 %v308_v61 }
  0x24   :  { %128 = vmatmul.mubr.f32.vlgmr.msra.gmra.mrb[0].mxu0 %v12_v34 }
  0xe9   :  { %v199_v62 = vpop.f32.mrb[0].mxu1 }
  0xea   :  { %v277_v63 = vpop.f32.mrb[1].mxu1 }
  0xf7   :  { %v253_v0 = vpop.f32.mrb[0].mxu0 }
  0xf8   :  { %v254_v1 = vpop.f32.mrb[1].mxu0 }
  0xf9   :  { %v255_v2 = vadd.f32 %v254_v1, %v253_v0 }
  0xfb   :  { %v200_v3 = vadd.f32 %v255_v2, %v199_v62 }
  0xfd   :  { %204 = vst.msk [vmem:[#allocation2] sm:$0xf] %vm203_vm5, %v200_v3 }
  0xfe   :  { %337 = shalt.err (!%p334_p4)
}
  0xff   :  { %s338_s8 = scalar_lea.hbm %s504_s2, 64 }
 0x100   :  { %p339_p5 = scmp.ne.s32.totalorder %s504_s2, %s338_s8  ;;  %p342_p6 = scmp.lt.u32.totalorder %s338_s8, %s504_s2 }
 0x102   :  { %p344_p7 = pnand %p342_p6, %p339_p5 }
 0x104   :  { %347 = shalt.err (!%p344_p7)
}
 0x105   :  { %214 = dma.vmem_to_hbm [thread:$0]  %s212_s5, 64, %s504_s2, [#allocation3]  }
 0x106   :  { %348 = dma.done.wait [#allocation3], 64  }
 0x107   :  { %349 = vsyncadd [#allocation3], 4294967232 }
 0x108   :  { %218 = vsyncpa [#allocation3], 1 }

</bundles_post_ra>
